<compile_context>
chip_gen: v7x
topology: tpu7x:2x2x1
jax: 0.10.0
libtpu: 0.0.40
codegen_flags: <defaults>
</compile_context>

<pallas_src>
import jax
import jax.numpy as jnp
from jax.experimental import pallas as pl
from jax.experimental.pallas import tpu as pltpu


def _round_up(a: int, b: int) -> int:
    return -(-a // b) * b


def _make_upsample_kernel(scale: int, rows: int, W: int):
    Wo = W * scale

    def upsample_kernel(x_ref, o_ref):
        x = x_ref[...]  # (rows, W), input dtype (no upcast)
        # Lane nearest-repeat: y[r, w*scale + t] = x[r, w]
        y = jnp.broadcast_to(x[:, :, None], (rows, W, scale)).reshape(rows, Wo)
        # The `scale` output image rows produced by input row r are identical,
        # and the output is viewed as (R, scale*Wo), so they are simply the
        # same lane-repeated row concatenated `scale` times along lanes.
        o_ref[...] = jnp.concatenate([y] * scale, axis=-1)  # (rows, scale*Wo)

    return upsample_kernel


def _pick_row_block(R: int, W: int, scale: int, itemsize: int) -> int:
    """Row block: fits a 6 MiB (in+out) pair AND yields ~8 (even) grid steps."""
    sub = max(8, 32 // itemsize)  # sublane packing: 8 (f32) / 16 (bf16) / 32 (i8)
    lane = 128

    def padded_row_bytes(width: int) -> int:
        # VMEM lane-pads the minor dim to a multiple of 128.
        return _round_up(width, lane) * itemsize

    # One fused input row + its folded output row (scale^2 * W wide).
    per_row = padded_row_bytes(W) + padded_row_bytes(W * scale * scale)
    # Budget for ONE (input, output) block pair; Pallas double-buffers, so live
    # VMEM is ~2x this.  Safe on every generation incl. v7x's 64 MiB VMEM.
    budget = 6 * 1024 * 1024
    budget_rb = max(sub, (budget // per_row) // sub * sub)
    # TODO(synk): for pathologically wide rows (per_row > budget) add a W-tiled
    # 2-D grid fallback instead of relying on this sublane-multiple floor.

    if R <= sub:
        return R  # truly tiny problem: single block

    # Never let the grid collapse to 1 step: target ~8 steps so the pipeline
    # reaches steady state and v7x's two TensorCores each get an equal share.
    target_steps = 8
    target_rb = _round_up(pl.cdiv(R, target_steps), sub)
    rb = max(sub, min(budget_rb, target_rb))

    # Best-effort: make the step count even (balanced across v7x's 2 TCs).
    steps = pl.cdiv(R, rb)
    if steps > 1 and steps % 2 == 1:
        rb2 = max(sub, _round_up(pl.cdiv(R, steps + 1), sub))
        if rb2 <= budget_rb and pl.cdiv(R, rb2) % 2 == 0:
            rb = rb2
    return rb


def scale_up(x: jax.Array, scale_factor: int = 2) -> jax.Array:
    """Nearest-neighbor upsampling of an NCHW tensor by integer `scale_factor`."""
    s = int(scale_factor)
    assert s == scale_factor and s >= 1, "integer scale_factor required"
    # TODO(synk): fractional scale factors / 'nearest-exact' are not covered.

    N, C, H, W = x.shape
    Ho, Wo = H * s, W * s

    R = N * C * H  # fused (N, C, H) row axis
    itemsize = jnp.dtype(x.dtype).itemsize
    rb = _pick_row_block(R, W, s, itemsize)
    grid = (pl.cdiv(R, rb),)

    x2 = x.reshape(R, W)  # free, contiguous view

    in_bytes = R * W * itemsize
    out_bytes = R * s * s * W * itemsize

    kernel = _make_upsample_kernel(s, rb, W)

    # Output viewed as (R, s*Wo): row r holds output rows [r*s, (r+1)*s) back to
    # back, so memory order is identical to (R*s, Wo) and the final reshape to
    # (N, C, Ho, Wo) is free.
    out2 = pl.pallas_call(
        kernel,
        out_shape=jax.ShapeDtypeStruct((R, s * Wo), x.dtype),
        grid_spec=pltpu.PrefetchScalarGridSpec(
            num_scalar_prefetch=0,
            grid=grid,
            in_specs=[pl.BlockSpec((rb, W), lambda i: (i, 0))],
            out_specs=pl.BlockSpec((rb, s * Wo), lambda i: (i, 0)),
        ),
        compiler_params=pltpu.CompilerParams(
            dimension_semantics=("parallel",),
            vmem_limit_bytes=32 * 1024 * 1024,
        ),
        cost_estimate=pl.CostEstimate(
            flops=0,
            transcendentals=0,
            bytes_accessed=in_bytes + out_bytes,
        ),
    )(x2)

    return out2.reshape(N, C, Ho, Wo)


def scale_up_ref(x: jax.Array, scale_factor: int = 2) -> jax.Array:
    """Pure-JAX reference (matches F.interpolate mode='nearest')."""
    return jnp.repeat(jnp.repeat(x, scale_factor, axis=2), scale_factor, axis=3)


if __name__ == "__main__":
    key = jax.random.PRNGKey(0)
    N, C, H, W = 2, 4, 16, 16
    x = jax.random.normal(key, (N, C, H, W), dtype=jnp.float32)

    out = scale_up(x, scale_factor=2)
    out = jax.block_until_ready(out)

    ref = scale_up_ref(x, scale_factor=2)
    assert out.shape == (N, C, 2 * H, 2 * W), out.shape
    assert jnp.allclose(out, ref), "mismatch vs reference nearest upsample"

    print("KERNEL_OK")
</pallas_src>

<mosaic_0001>
module attributes {stable_mosaic.version = 11 : i64} {
  func.func @upsample_kernel(%arg0: i32, %arg1: memref<16x16xf32, #tpu.memory_space<vmem>>, %arg2: memref<16x64xf32, #tpu.memory_space<vmem>>) attributes {dimension_semantics = [#tpu.dimension_semantics<parallel>], iteration_bounds = array<i64: 8>, scalar_prefetch = 0 : i64, scratch_operands = 0 : i64, tpu.core_type = #tpu.core_type<tc>, window_params = [{transform_indices = @transform_0, window_bounds = array<i64: 16, 16>}, {transform_indices = @transform_1, window_bounds = array<i64: 16, 64>}]} {
    %c0 = arith.constant 0 : index
    %c0_0 = arith.constant 0 : index
    %0 = vector.load %arg1[%c0, %c0_0] : memref<16x16xf32, #tpu.memory_space<vmem>>, vector<16x16xf32>
    %1 = vector.shape_cast %0 : vector<16x16xf32> to vector<16x16x1xf32>
    %2 = vector.shape_cast %1 : vector<16x16x1xf32> to vector<16x16x1xf32>
    %3 = vector.broadcast %2 : vector<16x16x1xf32> to vector<16x16x2xf32>
    %4 = vector.shape_cast %3 : vector<16x16x2xf32> to vector<16x32xf32>
    %5 = tpu.concatenate %4, %4 in 1 : vector<16x32xf32>, vector<16x32xf32> -> vector<16x64xf32>
    %c0_1 = arith.constant 0 : index
    %c0_2 = arith.constant 0 : index
    %6 = vector.load %arg2[%c0_1, %c0_2] : memref<16x64xf32, #tpu.memory_space<vmem>>, vector<16x64xf32>
    tpu.vector_store %arg2[%c0_1, %c0_2], %5 {strides = array<i32>} : memref<16x64xf32, #tpu.memory_space<vmem>>, vector<16x64xf32>,
    return
  }
  func.func @transform_0(%arg0: i32) -> (i32, i32) {
    %c0_i32 = arith.constant 0 : i32
    %c0_i32_0 = arith.constant 0 : i32
    return %arg0, %c0_i32 : i32, i32
  }
  func.func @transform_1(%arg0: i32) -> (i32, i32) {
    %c0_i32 = arith.constant 0 : i32
    %c0_i32_0 = arith.constant 0 : i32
    return %arg0, %c0_i32 : i32, i32
  }
}

</mosaic_0001>

<bundles_post_ra>
// kernel: tpu_custom_call.1
= control target key start
LH: loop header
LB: loop body
LE: loop exit
PB: predicated region body
PF: predicated region fallthrough
CT: control target
= control target key end

     0   :  { %s1150_s6 = smov 0   ;;  %s1384_s0 = inlined_call_operand.vmem [shape: f32[128,16], index: 0, kind: input, shape index: {}]   ;;  %s1385_s1 = inlined_call_operand.vmem [shape: f32[128,64], index: 1, kind: output, shape index: {}]  }
   0x1 LB: > { %s1077_s7 = sadd.s32 4294967295, %s1120_s6   ;;  %p1081_p0 = scmp.ge.s32.totalorder %s1120_s6, 1  ;;  %s1120_s6 = sphi %s1150_s6, %s11_s6  }
   0x2   : > { %p88_p1 = scmp.lt.s32.totalorder %s1120_s6, 9 }
   0x4   : > { %p89_p2 = pnand %p1081_p0, %p88_p1 }
   0x5   : > { %s1082_s8 = sshll.u32 (!%p89_p2), %s1077_s7, 1  ;;  %v122_v0 = vlaneseq (!%p89_p2)  ;;  %v1122_v30 = vmov (!%p89_p2), 1983009808   ;;  %v1123_v35 = vmov (!%p89_p2), 1934713408   ;;  %s1124_s13 = smov (!%p89_p2), 2  }
   0x6   : > { %92 = sbr.rel (%p89_p2) target bundleno = 465 (0x1d1), region = 24  ;;  %p109_p3 = scmp.lt.s32.totalorder (!%p89_p2), %s1082_s8, 15  ;;  %v301_v31 = vunpack.c.l.s4 (!%p89_p2), %v1122_v30  ;;  %v365_v36 = vunpack.c.l.s4 (!%p89_p2), %v1123_v35  ;;  %vm962_vm0 = vcmask (!%p89_p2), 15360   ;;  %vm965_vm1 = vcmask (!%p89_p2), 31744  }
   0x7   : > { %v1158_v1 = vshrl.u32 (!%p89_p2), %v122_v0, 7  ;;  %s1125_s14 = smov (!%p89_p2), 4   ;;  %s1126_s15 = smov (!%p89_p2), 6   ;;  %vm968_vm2 = vcmask (!%p89_p2), 48128   ;;  %vm971_vm3 = vcmask (!%p89_p2), 64512   ;;  %vm974_vm4 = vcmask (!%p89_p2), 80896  }
   0x8   : > { %v302_v34 = vunpack.c.0.s8 (!%p89_p2), %v301_v31  ;;  %v366_v42 = vunpack.c.0.s8 (!%p89_p2), %v365_v36  ;;  %s1127_s16 = smov (!%p89_p2), 8   ;;  %s1128_s17 = smov (!%p89_p2), 10   ;;  %vm977_vm5 = vcmask (!%p89_p2), 97280   ;;  %vm980_vm6 = vcmask (!%p89_p2), 113664  }
   0x9   : > { %v146_v2 = vsub.s32 (!%p89_p2), 2, %v1158_v1  ;;  %v124_v3 = vsub.s32 (!%p89_p2), 0, %v1158_v1  ;;  %v157_v4 = vsub.s32 (!%p89_p2), 3, %v1158_v1  ;;  %v135_v5 = vsub.s32 (!%p89_p2), 1, %v1158_v1  ;;  %s1129_s18 = smov (!%p89_p2), 12   ;;  %s1130_s19 = smov (!%p89_p2), 14  }
   0xa   : > { %v179_v11 = vsub.s32 (!%p89_p2), 5, %v1158_v1  ;;  %v168_v12 = vsub.s32 (!%p89_p2), 4, %v1158_v1  ;;  %v201_v15 = vsub.s32 (!%p89_p2), 7, %v1158_v1  ;;  %v190_v16 = vsub.s32 (!%p89_p2), 6, %v1158_v1  ;;  %s1131_s20 = smov (!%p89_p2), 16   ;;  %s1132_s21 = smov (!%p89_p2), 18  }
   0xb   : > { %v1177_v40 = vsub.s32 (!%p89_p2), %v302_v34, %v1158_v1  ;;  %v1184_v51 = vsub.s32 (!%p89_p2), %v366_v42, %v1158_v1  ;;  %s1133_s22 = smov (!%p89_p2), 20   ;;  %s1134_s23 = smov (!%p89_p2), 22   ;;  %vm983_vm7 = vcmask (!%p89_p2), 130048   ;;  %vm986_vm8 = vcmask (!%p89_p2), 146432  }
   0xc   : > { %s1135_s24 = smov (!%p89_p2), 24   ;;  %s1136_s25 = smov (!%p89_p2), 26   ;;  %vm989_vm9 = vcmask (!%p89_p2), 162816   ;;  %vm992_vm10 = vcmask (!%p89_p2), 179200   ;;  %vm995_vm11 = vcmask (!%p89_p2), 195584   ;;  %vm998_vm12 = vcmask (!%p89_p2), 211968  }
   0xd   : > { %s1387_s8 = smov (!%p109_p3, %s1082_s8), 15  ;;  %s1137_s26 = smov 28   ;;  %vm1001_vm13 = vcmask 228352   ;;  %vm1004_vm14 = vcmask 244736   ;;  %vm1015_vm15 = vcmask 261120  }
   0xe   : > { %s1083_s9 = sshll.u32 %s1387_s8, 3  ;;  %s1138_s27 = smov 30  }
   0xf   : > { %s112_s12 = scalar_lea.vmem %s1384_s0, %s1083_s9  ;;  %s1139_s28 = smov 32  }
  0x10   : > { %v120_v6 = vld [vmem:[%s112_s12] sm:$0xff]  ;;  %v121_v19 = vld [vmem:[%s112_s12 + $0x8] sm:$0xff]  ;;  %s118_s2 = scalar_lea.vmem %s1385_s1, %s1083_s9 }
  0x11   : > { %v147_v7 = vrot.slane %v120_v6, %v146_v2  ;;  %v125_v8 = vrot.slane %v120_v6, %v124_v3  ;;  %v158_v9 = vrot.slane %v120_v6, %v157_v4  ;;  %v136_v10 = vrot.slane %v120_v6, %v135_v5 }
  0x12   : > { %v180_v13 = vrot.slane %v120_v6, %v179_v11  ;;  %v169_v14 = vrot.slane %v120_v6, %v168_v12  ;;  %v202_v17 = vrot.slane %v120_v6, %v201_v15  ;;  %v191_v18 = vrot.slane %v120_v6, %v190_v16 }
  0x13   : > { %149 = vbcast.lane.b32.xlu1 %v147_v7, 256  ;;  %127 = vbcast.lane.b32.xlu0 %v125_v8, 256  ;;  %v224_v20 = vrot.slane %v121_v19, %v135_v5  ;;  %v213_v21 = vrot.slane %v121_v19, %v124_v3  ;;  %v246_v22 = vrot.slane %v121_v19, %v157_v4 }
  0x14   : > { %v235_v23 = vrot.slane %v121_v19, %v146_v2  ;;  %v268_v24 = vrot.slane %v121_v19, %v179_v11  ;;  %v257_v25 = vrot.slane %v121_v19, %v168_v12  ;;  %v290_v26 = vrot.slane %v121_v19, %v201_v15 }
  0x15   : > { %v279_v27 = vrot.slane %v121_v19, %v190_v16 }
  0x17   : > { %160 = vbcast.lane.b32.xlu1 %v158_v9, 256  ;;  %138 = vbcast.lane.b32.xlu0 %v136_v10, 256 }
  0x1b   : > { %182 = vbcast.lane.b32.xlu1 %v180_v13, 256  ;;  %171 = vbcast.lane.b32.xlu0 %v169_v14, 256 }
  0x1f   : > { %204 = vbcast.lane.b32.xlu1 %v202_v17, 256  ;;  %193 = vbcast.lane.b32.xlu0 %v191_v18, 256 }
  0x23   : > { %226 = vbcast.lane.b32.xlu1 %v224_v20, 256  ;;  %215 = vbcast.lane.b32.xlu0 %v213_v21, 256 }
  0x27   : > { %248 = vbcast.lane.b32.xlu1 %v246_v22, 256  ;;  %237 = vbcast.lane.b32.xlu0 %v235_v23, 256 }
  0x2b   : > { %270 = vbcast.lane.b32.xlu1 %v268_v24, 256  ;;  %259 = vbcast.lane.b32.xlu0 %v257_v25, 256 }
  0x2f   : > { %292 = vbcast.lane.b32.xlu1 %v290_v26, 256  ;;  %281 = vbcast.lane.b32.xlu0 %v279_v27, 256 }
  0x33   : > { %142 = vbcast.lane.b32.xlu1 %v136_v10, 264  ;;  %131 = vbcast.lane.b32.xlu0 %v125_v8, 264 }
  0x37   : > { %164 = vbcast.lane.b32.xlu1 %v158_v9, 264  ;;  %153 = vbcast.lane.b32.xlu0 %v147_v7, 264 }
  0x3b   : > { %186 = vbcast.lane.b32.xlu1 %v180_v13, 264  ;;  %175 = vbcast.lane.b32.xlu0 %v169_v14, 264 }
  0x3f   : > { %208 = vbcast.lane.b32.xlu1 %v202_v17, 264  ;;  %197 = vbcast.lane.b32.xlu0 %v191_v18, 264 }
  0x43   : > { %230 = vbcast.lane.b32.xlu1 %v224_v20, 264  ;;  %219 = vbcast.lane.b32.xlu0 %v213_v21, 264 }
  0x47   : > { %252 = vbcast.lane.b32.xlu1 %v246_v22, 264  ;;  %241 = vbcast.lane.b32.xlu0 %v235_v23, 264 }
  0x4b   : > { %274 = vbcast.lane.b32.xlu1 %v268_v24, 264  ;;  %263 = vbcast.lane.b32.xlu0 %v257_v25, 264 }
  0x4f   : > { %296 = vbcast.lane.b32.xlu1 %v290_v26, 264  ;;  %285 = vbcast.lane.b32.xlu0 %v279_v27, 264 }
  0x85   : > { %v150_v28 = vpop.permute.xlu1 %149  ;;  %v128_v29 = vpop.permute.xlu0 %127 }
  0x86   : > { %v298_v41 = vcombine.low %v128_v29, %v150_v28  ;;  %v299_v1 = vcombine.high %v128_v29, %v150_v28 }
  0x88   : > { %v306_v48 = vrot.slane %v298_v41, %v1177_v40  ;;  %v313_v13 = vrot.slane %v299_v1, %v1177_v40 }
  0x89   : > { %v161_v32 = vpop.permute.xlu1 %160  ;;  %v139_v33 = vpop.permute.xlu0 %138 }
  0x8a   : > { %v314_v37 = vcombine.low %v139_v33, %v161_v32  ;;  %v315_v59 = vcombine.high %v139_v33, %v161_v32 }
  0x8c   : > { %v322_v43 = vrot.slane %v314_v37, %v1177_v40  ;;  %v329_v6 = vrot.slane %v315_v59, %v1177_v40 }
  0x8d   : > { %v183_v38 = vpop.permute.xlu1 %182  ;;  %v172_v39 = vpop.permute.xlu0 %171 }
  0x8e   : > { %v362_v52 = vcombine.low %v306_v48, %v322_v43  ;;  %v363_v61 = vcombine.high %v306_v48, %v322_v43  ;;  %v378_v16 = vcombine.low %v313_v13, %v329_v6  ;;  %v379_v37 = vcombine.high %v313_v13, %v329_v6 }
  0x90   : > { %v1194_v0 = vrot.slane %v362_v52, %v1184_v51  ;;  %v377_v11 = vrot.slane %v363_v61, %v1184_v51  ;;  %v386_v30 = vrot.slane %v378_v16, %v1184_v51 }
  0x91   : > { %v205_v44 = vpop.permute.xlu1 %204  ;;  %v194_v45 = vpop.permute.xlu0 %193 }
  0x92   : > { %v346_v46 = vcombine.low %v183_v38, %v205_v44  ;;  %v330_v47 = vcombine.low %v172_v39, %v194_v45  ;;  %v347_v56 = vcombine.high %v183_v38, %v205_v44  ;;  %v331_v57 = vcombine.high %v172_v39, %v194_v45 }
  0x94   : > { %v354_v49 = vrot.slane %v346_v46, %v1177_v40  ;;  %v338_v50 = vrot.slane %v330_v47, %v1177_v40  ;;  %v361_v2 = vrot.slane %v347_v56, %v1177_v40  ;;  %v345_v3 = vrot.slane %v331_v57, %v1177_v40 }
  0x95   : > { %v1186_v53 = vpop.permute.xlu1 %226  ;;  %v1188_v54 = vpop.permute.xlu0 %215 }
  0x96   : > { %v394_v55 = vcombine.low %v338_v50, %v354_v49  ;;  %v395_v58 = vcombine.high %v338_v50, %v354_v49  ;;  %v410_v14 = vcombine.low %v345_v3, %v361_v2  ;;  %v411_v31 = vcombine.high %v345_v3, %v361_v2 }
  0x98   : > { %v1191_v60 = vrot.slane %v394_v55, %v1184_v51  ;;  %v409_v5 = vrot.slane %v395_v58, %v1184_v51  ;;  %v418_v24 = vrot.slane %v410_v14, %v1184_v51  ;;  %v425_v47 = vrot.slane %v411_v31, %v1184_v51 }
  0x99   : > { %v249_v62 = vpop.permute.xlu1 %248  ;;  %v238_v63 = vpop.permute.xlu0 %237  ;;  %v393_v55 = vrot.slane %v379_v37, %v1184_v51 }
  0x9a   : > { %v427_v4 = vcombine.high %v1194_v0, %v1191_v60  ;;  %v450_v7 = vcombine.low %v1186_v53, %v249_v62  ;;  %v434_v8 = vcombine.low %v1188_v54, %v238_v63  ;;  %v426_v12 = vcombine.low %v1194_v0, %v1191_v60 }
  0x9b   : > { %v428_v15 = vcombine.low %v377_v11, %v409_v5  ;;  %v429_v23 = vcombine.high %v377_v11, %v409_v5  ;;  %v430_v36 = vcombine.low %v386_v30, %v418_v24  ;;  %v451_v38 = vcombine.high %v1186_v53, %v249_v62 }
  0x9c   : > { %844 = vrot.lane.b32.xlu0 %v427_v4, %s1124_s13  ;;  %v458_v17 = vrot.slane %v450_v7, %v1177_v40  ;;  %v442_v18 = vrot.slane %v434_v8, %v1177_v40  ;;  %v435_v39 = vcombine.high %v1188_v54, %v238_v63  ;;  %v431_v46 = vcombine.high %v386_v30, %v418_v24 }
  0x9d   : > { %v271_v9 = vpop.permute.xlu1 %270  ;;  %v260_v10 = vpop.permute.xlu0 %259  ;;  %v465_v53 = vrot.slane %v451_v38, %v1177_v40  ;;  %v432_v63 = vcombine.low %v393_v55, %v425_v47 }
  0x9e   : > { %v498_v27 = vcombine.low %v442_v18, %v458_v17  ;;  %v499_v42 = vcombine.high %v442_v18, %v458_v17  ;;  %v449_v54 = vrot.slane %v435_v39, %v1177_v40 }
  0xa0   : > { %852 = vrot.lane.b32.xlu0 %v428_v15, %s1125_s14  ;;  %v1232_v45 = vrot.slane %v498_v27, %v1184_v51  ;;  %v513_v61 = vrot.slane %v499_v42, %v1184_v51  ;;  %v514_v3 = vcombine.low %v449_v54, %v465_v53 }
  0xa1   : > { %v293_v19 = vpop.permute.xlu1 %292  ;;  %v282_v20 = vpop.permute.xlu0 %281 }
  0xa2   : > { %v482_v21 = vcombine.low %v271_v9, %v293_v19  ;;  %v466_v22 = vcombine.low %v260_v10, %v282_v20  ;;  %v483_v33 = vcombine.high %v271_v9, %v293_v19  ;;  %v467_v34 = vcombine.high %v260_v10, %v282_v20 }
  0xa3   : > { %v433_v10 = vcombine.high %v393_v55, %v425_v47  ;;  %v522_v20 = vrot.slane %v514_v3, %v1184_v51 }
  0xa4   : > { %v490_v25 = vrot.slane %v482_v21, %v1177_v40  ;;  %v474_v26 = vrot.slane %v466_v22, %v1177_v40  ;;  %860 = vrot.lane.b32.xlu0 %v429_v23, %s1126_s15  ;;  %v497_v48 = vrot.slane %v483_v33, %v1177_v40  ;;  %v481_v49 = vrot.slane %v467_v34, %v1177_v40 }
  0xa5   : > { %v1216_v28 = vpop.permute.xlu1 %142  ;;  %v1218_v29 = vpop.permute.xlu0 %131  ;;  %v515_v23 = vcombine.high %v449_v54, %v465_v53 }
  0xa6   : > { %v530_v32 = vcombine.low %v474_v26, %v490_v25  ;;  %v531_v35 = vcombine.high %v474_v26, %v490_v25  ;;  %v546_v62 = vcombine.low %v481_v49, %v497_v48  ;;  %v547_v16 = vcombine.high %v481_v49, %v497_v48 }
  0xa7   : > { %v529_v48 = vrot.slane %v515_v23, %v1184_v51 }
  0xa8   : > { %v1224_v41 = vrot.slane %v530_v32, %v1184_v51  ;;  %868 = vrot.lane.b32.xlu0 %v430_v36, %s1127_s16  ;;  %v545_v52 = vrot.slane %v531_v35, %v1184_v51  ;;  %v554_v13 = vrot.slane %v546_v62, %v1184_v51  ;;  %v561_v33 = vrot.slane %v547_v16, %v1184_v51 }
  0xa9   : > { %v1227_v43 = vpop.permute.xlu1 %164  ;;  %v1229_v44 = vpop.permute.xlu0 %153 }
  0xaa   : > { %v563_v50 = vcombine.high %v1232_v45, %v1224_v41  ;;  %v586_v56 = vcombine.low %v1216_v28, %v1227_v43  ;;  %v570_v57 = vcombine.low %v1218_v29, %v1229_v44  ;;  %v564_v1 = vcombine.low %v513_v61, %v545_v52 }
  0xab   : > { %v562_v2 = vcombine.low %v1232_v45, %v1224_v41  ;;  %v565_v11 = vcombine.high %v513_v61, %v545_v52  ;;  %v566_v22 = vcombine.low %v522_v20, %v554_v13  ;;  %v587_v24 = vcombine.high %v1216_v28, %v1227_v43 }
  0xac   : > { %876 = vrot.lane.b32.xlu0 %v431_v46, %s1128_s17  ;;  %846 = vrot.lane.b32.xlu1 %v563_v50, %s1124_s13  ;;  %v1253_v4 = vrot.slane %v586_v56, %v1177_v40  ;;  %v1256_v5 = vrot.slane %v570_v57, %v1177_v40  ;;  %v571_v34 = vcombine.high %v1218_v29, %v1229_v44 }
  0xad   : > { %v187_v58 = vpop.permute.xlu1 %186  ;;  %v176_v59 = vpop.permute.xlu0 %175  ;;  %v567_v37 = vcombine.high %v522_v20, %v554_v13  ;;  %v1277_v43 = vrot.slane %v587_v24, %v1177_v40  ;;  %v568_v56 = vcombine.low %v529_v48, %v561_v33  ;;  %v569_v13 = vcombine.high %v529_v48, %v561_v33 }
  0xae   : > { %v634_v17 = vcombine.low %v1256_v5, %v1253_v4  ;;  %v635_v49 = vcombine.high %v1256_v5, %v1253_v4  ;;  %v1293_v53 = vrot.slane %v571_v34, %v1177_v40 }
  0xb0   : > { %884 = vrot.lane.b32.xlu0 %v432_v63, %s1129_s18  ;;  %854 = vrot.lane.b32.xlu1 %v564_v1, %s1125_s14  ;;  %v642_v32 = vrot.slane %v634_v17, %v1184_v51  ;;  %v649_v5 = vrot.slane %v635_v49, %v1184_v51 }
  0xb1   : > { %v209_v6 = vpop.permute.xlu1 %208  ;;  %v198_v7 = vpop.permute.xlu0 %197 }
  0xb2   : > { %v618_v8 = vcombine.low %v187_v58, %v209_v6  ;;  %v602_v9 = vcombine.low %v176_v59, %v198_v7  ;;  %v619_v26 = vcombine.high %v187_v58, %v209_v6  ;;  %v603_v27 = vcombine.high %v176_v59, %v198_v7 }
  0xb4   : > { %v626_v14 = vrot.slane %v618_v8, %v1177_v40  ;;  %v610_v15 = vrot.slane %v602_v9, %v1177_v40  ;;  %892 = vrot.lane.b32.xlu0 %v433_v10, %s1130_s19  ;;  %862 = vrot.lane.b32.xlu1 %v565_v11, %s1126_s15  ;;  %v1285_v29 = vrot.slane %v619_v26, %v1177_v40 }
  0xb5   : > { %v231_v18 = vpop.permute.xlu1 %230  ;;  %v220_v19 = vpop.permute.xlu0 %219  ;;  %v1288_v44 = vrot.slane %v603_v27, %v1177_v40  ;;  %v650_v10 = vcombine.low %v1293_v53, %v1277_v43 }
  0xb6   : > { %v666_v21 = vcombine.low %v610_v15, %v626_v14  ;;  %v667_v38 = vcombine.high %v610_v15, %v626_v14 }
  0xb7   : > { %v682_v1 = vcombine.low %v1288_v44, %v1285_v29  ;;  %v658_v24 = vrot.slane %v650_v10, %v1184_v51 }
  0xb8   : > { %v674_v25 = vrot.slane %v666_v21, %v1184_v51  ;;  %870 = vrot.lane.b32.xlu1 %v566_v22, %s1127_s16  ;;  %v681_v61 = vrot.slane %v667_v38, %v1184_v51 }
  0xb9   : > { %v253_v30 = vpop.permute.xlu1 %252  ;;  %v242_v31 = vpop.permute.xlu0 %241  ;;  %v690_v22 = vrot.slane %v682_v1, %v1184_v51 }
  0xba   : > { %v723_v35 = vcombine.high %v231_v18, %v253_v30  ;;  %v707_v36 = vcombine.high %v220_v19, %v242_v31  ;;  %v722_v28 = vcombine.low %v231_v18, %v253_v30  ;;  %v706_v39 = vcombine.low %v220_v19, %v242_v31 }
  0xbb   : > { %v698_v42 = vcombine.low %v642_v32, %v674_v25  ;;  %v699_v59 = vcombine.high %v642_v32, %v674_v25  ;;  %v700_v14 = vcombine.low %v649_v5, %v681_v61  ;;  %v701_v23 = vcombine.high %v649_v5, %v681_v61 }
  0xbc   : > { %v737_v46 = vrot.slane %v723_v35, %v1177_v40  ;;  %v721_v47 = vrot.slane %v707_v36, %v1177_v40  ;;  %878 = vrot.lane.b32.xlu1 %v567_v37, %s1128_s17  ;;  %v730_v57 = vrot.slane %v722_v28, %v1177_v40  ;;  %v714_v58 = vrot.slane %v706_v39, %v1177_v40 }
  0xbd   : > { %900 = vrot.lane.b32.xlu0 %v698_v42, %s1131_s20  ;;  %v275_v50 = vpop.permute.xlu1 %274  ;;  %v264_v52 = vpop.permute.xlu0 %263  ;;  %v683_v30 = vcombine.high %v1288_v44, %v1285_v29  ;;  %v702_v32 = vcombine.low %v658_v24, %v690_v22  ;;  %v651_v28 = vcombine.high %v1293_v53, %v1277_v43 }
  0xbe   : > { %v786_v54 = vcombine.low %v721_v47, %v737_v46  ;;  %v787_v55 = vcombine.high %v721_v47, %v737_v46  ;;  %v770_v11 = vcombine.low %v714_v58, %v730_v57  ;;  %v771_v38 = vcombine.high %v714_v58, %v730_v57 }
  0xbf   : > { %v703_v46 = vcombine.high %v658_v24, %v690_v22  ;;  %v697_v47 = vrot.slane %v683_v30, %v1184_v51  ;;  %v665_v49 = vrot.slane %v651_v28, %v1184_v51 }
  0xc0   : > { %v1299_v62 = vrot.slane %v786_v54, %v1184_v51  ;;  %v1302_v63 = vrot.slane %v787_v55, %v1184_v51  ;;  %886 = vrot.lane.b32.xlu1 %v568_v56, %s1129_s18  ;;  %v778_v25 = vrot.slane %v770_v11, %v1184_v51  ;;  %v785_v48 = vrot.slane %v771_v38, %v1184_v51 }
  0xc1   : > { %908 = vrot.lane.b32.xlu0 %v699_v59, %s1132_s21  ;;  %v297_v3 = vpop.permute.xlu1 %296  ;;  %v286_v4 = vpop.permute.xlu0 %285  ;;  %v704_v44 = vcombine.low %v665_v49, %v697_v47 }
  0xc2   : > { %v754_v6 = vcombine.low %v275_v50, %v297_v3  ;;  %v755_v7 = vcombine.high %v275_v50, %v297_v3  ;;  %v738_v8 = vcombine.low %v264_v52, %v286_v4  ;;  %v739_v9 = vcombine.high %v264_v52, %v286_v4 }
  0xc3   : > { %v705_v50 = vcombine.high %v665_v49, %v697_v47 }
  0xc4   : > { %v762_v15 = vrot.slane %v754_v6, %v1177_v40  ;;  %v769_v16 = vrot.slane %v755_v7, %v1177_v40  ;;  %v746_v17 = vrot.slane %v738_v8, %v1177_v40  ;;  %v753_v18 = vrot.slane %v739_v9, %v1177_v40  ;;  %894 = vrot.lane.b32.xlu1 %v569_v13, %s1130_s19 }
  0xc5   : > { %916 = vrot.lane.b32.xlu0 %v700_v14, %s1133_s22 }
  0xc6   : > { %v802_v19 = vcombine.low %v746_v17, %v762_v15  ;;  %v818_v20 = vcombine.low %v753_v18, %v769_v16  ;;  %v819_v21 = vcombine.high %v753_v18, %v769_v16  ;;  %v803_v31 = vcombine.high %v746_v17, %v762_v15 }
  0xc8   : > { %v810_v26 = vrot.slane %v802_v19, %v1184_v51  ;;  %v826_v27 = vrot.slane %v818_v20, %v1184_v51  ;;  %v833_v40 = vrot.slane %v819_v21, %v1184_v51  ;;  %v817_v42 = vrot.slane %v803_v31, %v1184_v51 }
  0xc9   : > { %924 = vrot.lane.b32.xlu0 %v701_v23, %s1134_s23 }
  0xca   : > { %v834_v33 = vcombine.low %v778_v25, %v810_v26  ;;  %v838_v34 = vcombine.low %v1299_v62, %v826_v27  ;;  %v839_v35 = vcombine.high %v1299_v62, %v826_v27  ;;  %v840_v36 = vcombine.low %v1302_v63, %v833_v40 }
  0xcb   : > { %v841_v37 = vcombine.high %v1302_v63, %v833_v40  ;;  %v835_v39 = vcombine.high %v778_v25, %v810_v26  ;;  %v836_v29 = vcombine.low %v785_v48, %v817_v42  ;;  %v837_v43 = vcombine.high %v785_v48, %v817_v42 }
  0xcc   : > { %902 = vrot.lane.b32.xlu1 %v834_v33, %s1131_s20 }
  0xcd   : > { %932 = vrot.lane.b32.xlu0 %v702_v32, %s1135_s24 }
  0xd0   : > { %910 = vrot.lane.b32.xlu1 %v835_v39, %s1132_s21 }
  0xd1   : > { %940 = vrot.lane.b32.xlu0 %v703_v46, %s1136_s25 }
  0xd4   : > { %918 = vrot.lane.b32.xlu1 %v836_v29, %s1133_s22 }
  0xd5   : > { %948 = vrot.lane.b32.xlu0 %v704_v44, %s1137_s26 }
  0xd8   : > { %926 = vrot.lane.b32.xlu1 %v837_v43, %s1134_s23 }
  0xd9   : > { %956 = vrot.lane.b32.xlu0 %v705_v50, %s1138_s27 }
  0xdc   : > { %934 = vrot.lane.b32.xlu1 %v838_v34, %s1135_s24 }
  0xe0   : > { %942 = vrot.lane.b32.xlu1 %v839_v35, %s1136_s25 }
  0xe4   : > { %950 = vrot.lane.b32.xlu1 %v840_v36, %s1137_s26 }
  0xe8   : > { %958 = vrot.lane.b32.xlu1 %v841_v37, %s1138_s27 }
 0x10e   : > { %v845_v52 = vpop.permute.xlu0 %844 }
 0x10f   : > { %v963_v8 = vsel %vm962_vm0, %v426_v12, %v845_v52 }
 0x112   : > { %v853_v53 = vpop.permute.xlu0 %852 }
 0x113   : > { %v966_v10 = vsel %vm965_vm1, %v963_v8, %v853_v53 }
 0x116   : > { %v861_v54 = vpop.permute.xlu0 %860 }
 0x117   : > { %v969_v13 = vsel %vm968_vm2, %v966_v10, %v861_v54 }
 0x11a   : > { %v869_v51 = vpop.permute.xlu0 %868 }
 0x11b   : > { %v972_v14 = vsel %vm971_vm3, %v969_v13, %v869_v51 }
 0x11e   : > { %v847_v55 = vpop.permute.xlu1 %846  ;;  %v877_v56 = vpop.permute.xlu0 %876 }
 0x11f   : > { %v975_v15 = vsel %vm974_vm4, %v972_v14, %v877_v56  ;;  %v964_v30 = vsel %vm962_vm0, %v562_v2, %v847_v55  ;;  %vm1018_vm0 = vcmask 523264  }
 0x122   : > { %v855_v57 = vpop.permute.xlu1 %854  ;;  %v885_v58 = vpop.permute.xlu0 %884 }
 0x123   : > { %v978_v60 = vsel %vm977_vm5, %v975_v15, %v885_v58  ;;  %v967_v31 = vsel %vm965_vm1, %v964_v30, %v855_v57 }
 0x126   : > { %v863_v59 = vpop.permute.xlu1 %862  ;;  %v893_v61 = vpop.permute.xlu0 %892 }
 0x127   : > { %v981_v12 = vsel %vm980_vm6, %v978_v60, %v893_v61  ;;  %v970_v33 = vsel %vm968_vm2, %v967_v31, %v863_v59 }
 0x12a   : > { %v871_v62 = vpop.permute.xlu1 %870 }
 0x12b   : > { %v973_v34 = vsel %vm971_vm3, %v970_v33, %v871_v62 }
 0x12e   : > { %v879_v63 = vpop.permute.xlu1 %878 }
 0x12f   : > { %v901_v1 = vpop.permute.xlu0 %900  ;;  %v976_v35 = vsel %vm974_vm4, %v973_v34, %v879_v63 }
 0x130   : > { %v984_v17 = vsel %vm983_vm7, %v981_v12, %v901_v1 }
 0x132   : > { %v887_v4 = vpop.permute.xlu1 %886 }
 0x133   : > { %v909_v3 = vpop.permute.xlu0 %908  ;;  %v979_v36 = vsel %vm977_vm5, %v976_v35, %v887_v4 }
 0x134   : > { %v987_v18 = vsel %vm986_vm8, %v984_v17, %v909_v3 }
 0x136   : > { %v895_v6 = vpop.permute.xlu1 %894 }
 0x137   : > { %v917_v5 = vpop.permute.xlu0 %916  ;;  %v982_v38 = vsel %vm980_vm6, %v979_v36, %v895_v6 }
 0x138   : > { %v990_v20 = vsel %vm989_vm9, %v987_v18, %v917_v5 }
 0x13b   : > { %v925_v7 = vpop.permute.xlu0 %924 }
 0x13c   : > { %v993_v22 = vsel %vm992_vm10, %v990_v20, %v925_v7 }
 0x13e   : > { %v903_v9 = vpop.permute.xlu1 %902 }
 0x13f   : > { %v933_v11 = vpop.permute.xlu0 %932  ;;  %v985_v41 = vsel %vm983_vm7, %v982_v38, %v903_v9 }
 0x140   : > { %v996_v23 = vsel %vm995_vm11, %v993_v22, %v933_v11 }
 0x142   : > { %v911_v16 = vpop.permute.xlu1 %910 }
 0x143   : > { %v941_v0 = vpop.permute.xlu0 %940  ;;  %v988_v45 = vsel %vm986_vm8, %v985_v41, %v911_v16 }
 0x144   : > { %v999_v24 = vsel %vm998_vm12, %v996_v23, %v941_v0 }
 0x146   : > { %v919_v19 = vpop.permute.xlu1 %918 }
 0x147   : > { %v949_v21 = vpop.permute.xlu0 %948  ;;  %v991_v2 = vsel %vm989_vm9, %v988_v45, %v919_v19 }
 0x148   : > { %v1002_v26 = vsel %vm1001_vm13, %v999_v24, %v949_v21 }
 0x14a   : > { %v927_v25 = vpop.permute.xlu1 %926 }
 0x14b   : > { %v957_v27 = vpop.permute.xlu0 %956  ;;  %v994_v39 = vsel %vm992_vm10, %v991_v2, %v927_v25 }
 0x14c   : > { %v1005_v40 = vsel %vm1004_vm14, %v1002_v26, %v957_v27 }
 0x14d   : > { %1009 = vrot.lane.b32.xlu0 %v1005_v40, %s1139_s28 }
 0x14e   : > { %v935_v32 = vpop.permute.xlu1 %934 }
 0x14f   : > { %v997_v42 = vsel %vm995_vm11, %v994_v39, %v935_v32 }
 0x152   : > { %v943_v37 = vpop.permute.xlu1 %942 }
 0x153   : > { %v1000_v46 = vsel %vm998_vm12, %v997_v42, %v943_v37 }
 0x156   : > { %v951_v28 = vpop.permute.xlu1 %950 }
 0x157   : > { %v1003_v47 = vsel %vm1001_vm13, %v1000_v46, %v951_v28 }
 0x15a   : > { %v959_v48 = vpop.permute.xlu1 %958 }
 0x15b   : > { %v1006_v49 = vsel %vm1004_vm14, %v1003_v47, %v959_v48 }
 0x15c   : > { %1011 = vrot.lane.b32.xlu1 %v1006_v49, %s1139_s28 }
 0x1bf   : > { %v1010_v29 = vpop.permute.xlu0 %1009 }
 0x1c0   : > { %v1016_v44 = vsel %vm1015_vm15, %v1005_v40, %v1010_v29 }
 0x1c1   : > { %1019 = vst.msk [vmem:[%s118_s2] sm:$0xff] %vm1018_vm0, %v1016_v44 }
 0x1ce   : > { %v1012_v43 = vpop.permute.xlu1 %1011 }
 0x1cf   : > { %v1017_v50 = vsel %vm1015_vm15, %v1006_v49, %v1012_v43 }
 0x1d0   : > { %1020 = vst.msk [vmem:[%s118_s2 + $0x8] sm:$0xff] %vm1018_vm0, %v1017_v50 }
 0x1d1 PF: > { %s11_s6 = sadd.s32 1, %s1120_s6  }
 0x1d2   : > { %p8_p4 = scmp.ge.s32.totalorder %s11_s6, 10  }
 0x1d4   :  { %10 = sbr.rel (!%p8_p4) target bundleno = 1 (0x1), region = 54 }

</bundles_post_ra>
